<compile_context>
chip_gen: v5e
topology: v5e:2x2
jax: 0.10.0
libtpu: 0.0.40
codegen_flags: <defaults>
</compile_context>

<pallas_src>
import numpy as np
import jax
import jax.numpy as jnp
from jax.experimental import pallas as pl
from jax.experimental.pallas import tpu as pltpu

C = 4           # latent channels
H = W = 16      # spatial
SEQ = 8         # text sequence length
CTX = 32        # cross-attention context dim
HIDDEN = 32     # stand-in inner-model hidden width
CIN = 2 * C     # z concatenated with c_concat along channels
P = H * W       # pixels per image (256) -> lane axis
CPAD = 8        # output channels padded to a full sublane tile


# ----------------------------------------------------------------------------
# Pallas kernel: single fused step (grid-less).
#   coefs_ref  : SMEM (4,)      [c_in, i_scale, 1 - i_scale, t_scale]
#   z_ref      : (C, P)         latent, pixels on lanes
#   cc_ref     : (C, P)         cond  c_concat
#   uc_ref     : (C, P)         uncond c_concat
#   ctx_ref    : (2*SEQ, CTX)   [cond crossattn ; uncond crossattn] token rows
#   w1tz_ref   : (HIDDEN, C)    = w1[:C].T   (z half of first layer)
#   w1tc_ref   : (HIDDEN, C)    = w1[C:].T   (c_concat half)
#   b1_ref     : (HIDDEN, 1)
#   w2t_ref    : (CPAD, HIDDEN) = w2.T zero-padded to 8 rows
#   b2_ref     : (CPAD, 1)      zero-padded
#   wctx_t_ref : (CPAD, CTX)    = wctx.T zero-padded
#   o_ref      : (CPAD, P)      full (8,256) tile store; wrapper slices [:C]
# ----------------------------------------------------------------------------
def _cfg_kernel(coefs_ref, z_ref, cc_ref, uc_ref, ctx_ref,
                w1tz_ref, w1tc_ref, b1_ref, w2t_ref, b2_ref, wctx_t_ref,
                o_ref):
    c_in = coefs_ref[0]        # k-diffusion input scale 1/sqrt(sigma^2+1)
    c_shared = coefs_ref[1]    # image_cfg_scale        (cond + img branches)
    c_unc = coefs_ref[2]       # 1 - image_cfg_scale    (uncond branch)
    c_txt = coefs_ref[3]       # text_cfg_scale         (cond crossattn weight)

    # Fold c_in into the (tiny) first-layer weights instead of the activations.
    w1tz = w1tz_ref[...] * c_in                                    # (HIDDEN, C)
    w1tc = w1tc_ref[...] * c_in                                    # (HIDDEN, C)

    # First stage: 3 small matmuls; the z-contribution is shared by both
    # deduped branches (cond/img share (z, cond c_concat)).
    hz = jnp.dot(w1tz, z_ref[...], preferred_element_type=jnp.float32)
    h_shared = jax.nn.gelu(
        hz + jnp.dot(w1tc, cc_ref[...], preferred_element_type=jnp.float32)
        + b1_ref[...], approximate=True)                           # (HIDDEN, P)
    h_unc = jax.nn.gelu(
        hz + jnp.dot(w1tc, uc_ref[...], preferred_element_type=jnp.float32)
        + b1_ref[...], approximate=True)                           # (HIDDEN, P)

    # Linear CFG combine of hidden activations, then ONE second-stage matmul.
    #   chain coefficients: i * f(z,cc) + (1-i) * f(z,uc)
    h_comb = c_shared * h_shared + c_unc * h_unc                   # (HIDDEN, P)
    y = jnp.dot(w2t_ref[...], h_comb,
                preferred_element_type=jnp.float32)                # (CPAD, P)

    # Text conditioning: single weighted cross-sublane reduce over the stacked
    # [cond ; uncond] token rows (coefs t/SEQ and (1-t)/SEQ), then project to
    # channels as a (CPAD, 1) column (no in-kernel transposes).
    rows = jax.lax.broadcasted_iota(jnp.int32, (2 * SEQ, 1), 0)
    inv_seq = 1.0 / SEQ
    coef = jnp.where(rows < SEQ, c_txt * inv_seq,
                     (1.0 - c_txt) * inv_seq)                      # (2*SEQ, 1)
    pooled = jnp.sum(coef * ctx_ref[...], axis=0, keepdims=True)   # (1, CTX)
    proj_col = jnp.sum(wctx_t_ref[...] * pooled,
                       axis=1, keepdims=True)                      # (CPAD, 1)

    o_ref[...] = (y + b2_ref[...] + proj_col).astype(o_ref.dtype)


def cfg_denoise_pallas(coefs, z_cp, cc_cp, uc_cp, ctx2, params_t):
    w1tz, w1tc, b1c, w2t_pad, b2_pad, wctx_t_pad = params_t
    vmem = pl.BlockSpec(memory_space=pltpu.MemorySpace.VMEM)
    return pl.pallas_call(
        _cfg_kernel,
        out_shape=jax.ShapeDtypeStruct((CPAD, P), jnp.float32),
        in_specs=[
            pl.BlockSpec(memory_space=pltpu.MemorySpace.SMEM),   # coefs (4,)
            vmem,   # z      (C, P)
            vmem,   # cc     (C, P)
            vmem,   # uc     (C, P)
            vmem,   # ctx    (2*SEQ, CTX)
            vmem,   # w1tz   (HIDDEN, C)
            vmem,   # w1tc   (HIDDEN, C)
            vmem,   # b1     (HIDDEN, 1)
            vmem,   # w2t    (CPAD, HIDDEN)
            vmem,   # b2     (CPAD, 1)
            vmem,   # wctx_t (CPAD, CTX)
        ],
        out_specs=pl.BlockSpec(memory_space=pltpu.MemorySpace.VMEM),
        cost_estimate=pl.CostEstimate(flops=350_000,
                                      transcendentals=16_384,
                                      bytes_accessed=26_000),
    )(coefs, z_cp, cc_cp, uc_cp, ctx2, w1tz, w1tc, b1c, w2t_pad, b2_pad,
      wctx_t_pad)


# ----------------------------------------------------------------------------
# One-time parameter prep (hoisted out of the per-step path): transposes,
# bias reshapes, split of w1 into z / c_concat halves, zero-padding of the
# output-side params to a full 8-row sublane tile.
# ----------------------------------------------------------------------------
def prepare_params(params):
    w1, b1, w2, b2, wctx = params
    w1t = w1.T                                            # (HIDDEN, CIN)
    w1tz = jnp.asarray(w1t[:, :C], jnp.float32)           # (HIDDEN, C)
    w1tc = jnp.asarray(w1t[:, C:], jnp.float32)           # (HIDDEN, C)
    b1c = jnp.asarray(b1.reshape(HIDDEN, 1), jnp.float32)
    w2t_pad = jnp.zeros((CPAD, HIDDEN), jnp.float32).at[:C, :].set(w2.T)
    b2_pad = jnp.zeros((CPAD, 1), jnp.float32).at[:C, :].set(b2.reshape(C, 1))
    wctx_t_pad = jnp.zeros((CPAD, CTX), jnp.float32).at[:C, :].set(wctx.T)
    return (w1tz, w1tc, b1c, w2t_pad, b2_pad, wctx_t_pad)


# ----------------------------------------------------------------------------
# JAX glue reproducing CFGDenoiser.forward semantics; the whole per-step path
# is one jit (input reshapes + scalar coefficient math fuse into a single
# prologue, then one pallas_call, then the [:C] slice / NCHW reshape).
# ----------------------------------------------------------------------------
@jax.jit
def cfg_denoiser_forward(z, sigma, cond, uncond,
                         text_cfg_scale, image_cfg_scale, params_t):
    # Lane-dense activation layout: channels on sublanes, pixels on lanes.
    z_cp = z.reshape(C, P)
    cc_cp = cond['c_concat'][0].reshape(C, P)
    uc_cp = uncond['c_concat'][0].reshape(C, P)

    # Stacked [cond ; uncond] crossattn token rows (branch-major).
    ctx2 = jnp.concatenate([cond['c_crossattn'][0][0],
                            uncond['c_crossattn'][0][0]], axis=0)  # (2*SEQ, CTX)

    t = jnp.asarray(text_cfg_scale, jnp.float32)
    i = jnp.asarray(image_cfg_scale, jnp.float32)
    s = jnp.asarray(sigma, jnp.float32)[0]
    c_in = 1.0 / jnp.sqrt(s * s + 1.0)
    # CFG combine: out = (1-i)*unc + (i-t)*img + t*cond; with identical UNet
    # inputs for cond/img the chain coefficients collapse to [i, 1-i] and the
    # (additive) crossattn coefficients to [t, 1-t].
    coefs = jnp.stack([c_in, i, 1.0 - i, t]).astype(jnp.float32)   # (4,)

    out_cp = cfg_denoise_pallas(coefs, z_cp, cc_cp, uc_cp, ctx2, params_t)
    return out_cp[:C, :].reshape(1, C, H, W)


# ----------------------------------------------------------------------------
# Pure-JAX reference (full 3-branch compute, then CFG combine — same semantics
# as the PyTorch module) for a correctness check of the fused kernel.
# ----------------------------------------------------------------------------
def cfg_denoiser_forward_ref(z, sigma, cond, uncond,
                             text_cfg_scale, image_cfg_scale, params):
    w1, b1, w2, b2, wctx = params
    cfg_z = jnp.tile(z, (3, 1, 1, 1))
    cfg_crossattn = jnp.concatenate(
        [cond['c_crossattn'][0], uncond['c_crossattn'][0],
         uncond['c_crossattn'][0]], axis=0)
    cfg_concat = jnp.concatenate(
        [cond['c_concat'][0], cond['c_concat'][0],
         uncond['c_concat'][0]], axis=0)

    x_cat = jnp.concatenate([cfg_z, cfg_concat], axis=1)            # (3, 2C, H, W)
    x_flat = jnp.transpose(x_cat, (0, 2, 3, 1)).reshape(3, P, CIN)  # (3, P, CIN)

    c_in = 1.0 / jnp.sqrt(jnp.asarray(sigma, jnp.float32)[0] ** 2 + 1.0)
    x = x_flat * c_in
    h = jax.nn.gelu(jnp.einsum('bpi,ih->bph', x, w1) + b1, approximate=True)
    y = jnp.einsum('bph,hc->bpc', h, w2) + b2
    proj = jnp.mean(cfg_crossattn, axis=1) @ wctx                   # (3, C)
    y = y + proj[:, None, :]

    out_cond, out_img_cond, out_uncond = y[0], y[1], y[2]
    res = (out_uncond
           + text_cfg_scale * (out_cond - out_img_cond)
           + image_cfg_scale * (out_img_cond - out_uncond))         # (P, C)
    return jnp.transpose(res.reshape(1, H, W, C), (0, 3, 1, 2))


if __name__ == "__main__":
    key = jax.random.PRNGKey(0)
    keys = jax.random.split(key, 9)

    # Inputs (PyTorch-convention NCHW for z / c_concat).
    z = jax.random.normal(keys[0], (1, C, H, W), jnp.float32)
    sigma = jnp.array([1.5], jnp.float32)
    cond = {
        'c_crossattn': [jax.random.normal(keys[1], (1, SEQ, CTX), jnp.float32)],
        'c_concat': [jax.random.normal(keys[2], (1, C, H, W), jnp.float32)],
    }
    uncond = {
        'c_crossattn': [jax.random.normal(keys[3], (1, SEQ, CTX), jnp.float32)],
        'c_concat': [jnp.zeros((1, C, H, W), jnp.float32)],
    }
    text_cfg_scale = 7.5
    image_cfg_scale = 1.5

    # Deterministic synthetic inner-model parameters.
    params = (
        0.05 * jax.random.normal(keys[4], (CIN, HIDDEN), jnp.float32),
        0.01 * jax.random.normal(keys[5], (1, HIDDEN), jnp.float32),
        0.05 * jax.random.normal(keys[6], (HIDDEN, C), jnp.float32),
        0.01 * jax.random.normal(keys[7], (1, C), jnp.float32),
        0.05 * jax.random.normal(keys[8], (CTX, C), jnp.float32),
    )

    # One-time (hoisted) parameter prep; per-step path is a single jit.
    params_t = prepare_params(params)

    out = cfg_denoiser_forward(z, sigma, cond, uncond,
                               text_cfg_scale, image_cfg_scale, params_t)
    out = jax.block_until_ready(out)
    ref = cfg_denoiser_forward_ref(z, sigma, cond, uncond,
                                   text_cfg_scale, image_cfg_scale, params)

    assert out.shape == (1, C, H, W)
    np.testing.assert_allclose(np.asarray(out), np.asarray(ref),
                               rtol=1e-4, atol=1e-4)
    print("KERNEL_OK")
</pallas_src>

<mosaic_0001>
module attributes {stable_mosaic.version = 11 : i64} {
  func.func @_cfg_kernel(%arg0: memref<4xf32, #tpu.memory_space<smem>>, %arg1: memref<4x256xf32, #tpu.memory_space<vmem>>, %arg2: memref<4x256xf32, #tpu.memory_space<vmem>>, %arg3: memref<4x256xf32, #tpu.memory_space<vmem>>, %arg4: memref<16x32xf32, #tpu.memory_space<vmem>>, %arg5: memref<32x4xf32, #tpu.memory_space<vmem>>, %arg6: memref<32x4xf32, #tpu.memory_space<vmem>>, %arg7: memref<32x1xf32, #tpu.memory_space<vmem>>, %arg8: memref<8x32xf32, #tpu.memory_space<vmem>>, %arg9: memref<8x1xf32, #tpu.memory_space<vmem>>, %arg10: memref<8x32xf32, #tpu.memory_space<vmem>>, %arg11: memref<8x256xf32, #tpu.memory_space<vmem>>) attributes {dimension_semantics = [], scalar_prefetch = 0 : i64, scratch_operands = 0 : i64, tpu.core_type = #tpu.core_type<tc>} {
    %c0 = arith.constant 0 : index
    %0 = memref.load %arg0[%c0] : memref<4xf32, #tpu.memory_space<smem>>
    %c1 = arith.constant 1 : index
    %1 = memref.load %arg0[%c1] : memref<4xf32, #tpu.memory_space<smem>>
    %c2 = arith.constant 2 : index
    %2 = memref.load %arg0[%c2] : memref<4xf32, #tpu.memory_space<smem>>
    %c3 = arith.constant 3 : index
    %3 = memref.load %arg0[%c3] : memref<4xf32, #tpu.memory_space<smem>>
    %c0_0 = arith.constant 0 : index
    %c0_1 = arith.constant 0 : index
    %4 = vector.load %arg5[%c0_0, %c0_1] : memref<32x4xf32, #tpu.memory_space<vmem>>, vector<32x4xf32>
    %5 = vector.broadcast %0 : f32 to vector<32x4xf32>
    %6 = arith.mulf %4, %5 : vector<32x4xf32>
    %c0_2 = arith.constant 0 : index
    %c0_3 = arith.constant 0 : index
    %7 = vector.load %arg6[%c0_2, %c0_3] : memref<32x4xf32, #tpu.memory_space<vmem>>, vector<32x4xf32>
    %8 = vector.broadcast %0 : f32 to vector<32x4xf32>
    %9 = arith.mulf %7, %8 : vector<32x4xf32>
    %c0_4 = arith.constant 0 : index
    %c0_5 = arith.constant 0 : index
    %10 = vector.load %arg1[%c0_4, %c0_5] : memref<4x256xf32, #tpu.memory_space<vmem>>, vector<4x256xf32>
    %cst = arith.constant dense<0.000000e+00> : vector<32x256xf32>
    %11 = tpu.matmul %6, %10, %cst {dimension_numbers = #tpu.dot_dimension_numbers<[1], [0], [0], [1], [0, 0, 1, 1], [], []>} : vector<32x4xf32>, vector<4x256xf32>, vector<32x256xf32> -> vector<32x256xf32>
    %c0_6 = arith.constant 0 : index
    %c0_7 = arith.constant 0 : index
    %12 = vector.load %arg2[%c0_6, %c0_7] : memref<4x256xf32, #tpu.memory_space<vmem>>, vector<4x256xf32>
    %cst_8 = arith.constant dense<0.000000e+00> : vector<32x256xf32>
    %13 = tpu.matmul %9, %12, %cst_8 {dimension_numbers = #tpu.dot_dimension_numbers<[1], [0], [0], [1], [0, 0, 1, 1], [], []>} : vector<32x4xf32>, vector<4x256xf32>, vector<32x256xf32> -> vector<32x256xf32>
    %14 = arith.addf %11, %13 : vector<32x256xf32>
    %c0_9 = arith.constant 0 : index
    %c0_10 = arith.constant 0 : index
    %15 = vector.load %arg7[%c0_9, %c0_10] : memref<32x1xf32, #tpu.memory_space<vmem>>, vector<32x1xf32>
    %16 = vector.broadcast %15 : vector<32x1xf32> to vector<32x256xf32>
    %17 = arith.addf %14, %16 : vector<32x256xf32>
    %18 = arith.mulf %17, %17 : vector<32x256xf32>
    %19 = arith.mulf %17, %18 : vector<32x256xf32>
    %cst_11 = arith.constant 4.471500e-02 : f32
    %20 = vector.broadcast %cst_11 : f32 to vector<32x256xf32>
    %21 = arith.mulf %20, %19 : vector<32x256xf32>
    %22 = arith.addf %17, %21 : vector<32x256xf32>
    %cst_12 = arith.constant 0.797884583 : f32
    %23 = vector.broadcast %cst_12 : f32 to vector<32x256xf32>
    %24 = arith.mulf %23, %22 : vector<32x256xf32>
    %25 = math.tanh %24 : vector<32x256xf32>
    %cst_13 = arith.constant 1.000000e+00 : f32
    %26 = vector.broadcast %cst_13 : f32 to vector<32x256xf32>
    %27 = arith.addf %26, %25 : vector<32x256xf32>
    %cst_14 = arith.constant 5.000000e-01 : f32
    %28 = vector.broadcast %cst_14 : f32 to vector<32x256xf32>
    %29 = arith.mulf %28, %27 : vector<32x256xf32>
    %30 = arith.mulf %17, %29 : vector<32x256xf32>
    %c0_15 = arith.constant 0 : index
    %c0_16 = arith.constant 0 : index
    %31 = vector.load %arg3[%c0_15, %c0_16] : memref<4x256xf32, #tpu.memory_space<vmem>>, vector<4x256xf32>
    %cst_17 = arith.constant dense<0.000000e+00> : vector<32x256xf32>
    %32 = tpu.matmul %9, %31, %cst_17 {dimension_numbers = #tpu.dot_dimension_numbers<[1], [0], [0], [1], [0, 0, 1, 1], [], []>} : vector<32x4xf32>, vector<4x256xf32>, vector<32x256xf32> -> vector<32x256xf32>
    %33 = arith.addf %11, %32 : vector<32x256xf32>
    %c0_18 = arith.constant 0 : index
    %c0_19 = arith.constant 0 : index
    %34 = vector.load %arg7[%c0_18, %c0_19] : memref<32x1xf32, #tpu.memory_space<vmem>>, vector<32x1xf32>
    %35 = vector.broadcast %34 : vector<32x1xf32> to vector<32x256xf32>
    %36 = arith.addf %33, %35 : vector<32x256xf32>
    %37 = arith.mulf %36, %36 : vector<32x256xf32>
    %38 = arith.mulf %36, %37 : vector<32x256xf32>
    %cst_20 = arith.constant 4.471500e-02 : f32
    %39 = vector.broadcast %cst_20 : f32 to vector<32x256xf32>
    %40 = arith.mulf %39, %38 : vector<32x256xf32>
    %41 = arith.addf %36, %40 : vector<32x256xf32>
    %cst_21 = arith.constant 0.797884583 : f32
    %42 = vector.broadcast %cst_21 : f32 to vector<32x256xf32>
    %43 = arith.mulf %42, %41 : vector<32x256xf32>
    %44 = math.tanh %43 : vector<32x256xf32>
    %cst_22 = arith.constant 1.000000e+00 : f32
    %45 = vector.broadcast %cst_22 : f32 to vector<32x256xf32>
    %46 = arith.addf %45, %44 : vector<32x256xf32>
    %cst_23 = arith.constant 5.000000e-01 : f32
    %47 = vector.broadcast %cst_23 : f32 to vector<32x256xf32>
    %48 = arith.mulf %47, %46 : vector<32x256xf32>
    %49 = arith.mulf %36, %48 : vector<32x256xf32>
    %50 = vector.broadcast %1 : f32 to vector<32x256xf32>
    %51 = arith.mulf %50, %30 : vector<32x256xf32>
    %52 = vector.broadcast %2 : f32 to vector<32x256xf32>
    %53 = arith.mulf %52, %49 : vector<32x256xf32>
    %54 = arith.addf %51, %53 : vector<32x256xf32>
    %c0_24 = arith.constant 0 : index
    %c0_25 = arith.constant 0 : index
    %55 = vector.load %arg8[%c0_24, %c0_25] : memref<8x32xf32, #tpu.memory_space<vmem>>, vector<8x32xf32>
    %cst_26 = arith.constant dense<0.000000e+00> : vector<8x256xf32>
    %56 = tpu.matmul %55, %54, %cst_26 {dimension_numbers = #tpu.dot_dimension_numbers<[1], [0], [0], [1], [0, 0, 1, 1], [], []>} : vector<8x32xf32>, vector<32x256xf32>, vector<8x256xf32> -> vector<8x256xf32>
    %57 = tpu.iota {dimensions = array<i32: 0>} : vector<16x1xi32>
    %c8_i32 = arith.constant 8 : i32
    %58 = vector.broadcast %c8_i32 : i32 to vector<16x1xi32>
    %59 = arith.cmpi slt, %57, %58 : vector<16x1xi32>
    %cst_27 = arith.constant 1.250000e-01 : f32
    %60 = arith.mulf %3, %cst_27 : f32
    %cst_28 = arith.constant 1.000000e+00 : f32
    %61 = arith.subf %cst_28, %3 : f32
    %cst_29 = arith.constant 1.250000e-01 : f32
    %62 = arith.mulf %61, %cst_29 : f32
    %63 = vector.broadcast %60 : f32 to vector<16x1xf32>
    %64 = vector.broadcast %62 : f32 to vector<16x1xf32>
    %65 = arith.select %59, %63, %64 : vector<16x1xi1>, vector<16x1xf32>
    %c0_30 = arith.constant 0 : index
    %c0_31 = arith.constant 0 : index
    %66 = vector.load %arg4[%c0_30, %c0_31] : memref<16x32xf32, #tpu.memory_space<vmem>>, vector<16x32xf32>
    %67 = vector.broadcast %65 : vector<16x1xf32> to vector<16x32xf32>
    %68 = arith.mulf %67, %66 : vector<16x32xf32>
    %cst_32 = arith.constant dense<0.000000e+00> : vector<32xf32>
    %69 = vector.multi_reduction <add>, %68, %cst_32 [0] : vector<16x32xf32> to vector<32xf32>
    %70 = vector.shape_cast %69 : vector<32xf32> to vector<1x32xf32>
    %c0_33 = arith.constant 0 : index
    %c0_34 = arith.constant 0 : index
    %71 = vector.load %arg10[%c0_33, %c0_34] : memref<8x32xf32, #tpu.memory_space<vmem>>, vector<8x32xf32>
    %72 = vector.broadcast %70 : vector<1x32xf32> to vector<8x32xf32>
    %73 = arith.mulf %71, %72 : vector<8x32xf32>
    %cst_35 = arith.constant dense<0.000000e+00> : vector<8xf32>
    %74 = vector.multi_reduction <add>, %73, %cst_35 [1] : vector<8x32xf32> to vector<8xf32>
    %75 = vector.shape_cast %74 : vector<8xf32> to vector<8x1xf32>
    %c0_36 = arith.constant 0 : index
    %c0_37 = arith.constant 0 : index
    %76 = vector.load %arg9[%c0_36, %c0_37] : memref<8x1xf32, #tpu.memory_space<vmem>>, vector<8x1xf32>
    %77 = vector.broadcast %76 : vector<8x1xf32> to vector<8x256xf32>
    %78 = arith.addf %56, %77 : vector<8x256xf32>
    %79 = vector.broadcast %75 : vector<8x1xf32> to vector<8x256xf32>
    %80 = arith.addf %78, %79 : vector<8x256xf32>
    %c0_38 = arith.constant 0 : index
    %c0_39 = arith.constant 0 : index
    %81 = vector.load %arg11[%c0_38, %c0_39] : memref<8x256xf32, #tpu.memory_space<vmem>>, vector<8x256xf32>
    tpu.vector_store %arg11[%c0_38, %c0_39], %80 {strides = array<i32>} : memref<8x256xf32, #tpu.memory_space<vmem>>, vector<8x256xf32>,
    return
  }
}

</mosaic_0001>

<bundles_post_ra>
// kernel: cfg_denoiser_forward.1
= control target key start
LH: loop header
LB: loop body
LE: loop exit
PB: predicated region body
PF: predicated region fallthrough
CT: control target
= control target key end

     0   :  { %16 = vsyncpa [#allocation3], 0  ;;  %s703_s20 = smov [#allocation2]   ;;  %s1044_s0 = inlined_call_operand.vmem [shape: f32[4], index: 0, kind: input, shape index: {}]   ;;  %s1045_s1 = inlined_call_operand.vmem [shape: f32[4,256], index: 1, kind: input, shape index: {}]   ;;  %s1046_s2 = inlined_call_operand.vmem [shape: f32[4,256], index: 2, kind: input, shape index: {}]   ;;  %s1047_s3 = inlined_call_operand.vmem [shape: f32[4,256], index: 3, kind: input, shape index: {}]   ;;  %s1048_s4 = inlined_call_operand.vmem [shape: f32[16,32], index: 4, kind: input, shape index: {}]   ;;  %s1049_s5 = inlined_call_operand.vmem [shape: f32[32,4], index: 5, kind: input, shape index: {}]   ;;  %s1050_s6 = inlined_call_operand.vmem [shape: f32[32,4], index: 6, kind: input, shape index: {}]   ;;  %s1051_s7 = inlined_call_operand.vmem [shape: f32[32,1], index: 7, kind: input, shape index: {}]   ;;  %s1052_s8 = inlined_call_operand.vmem [shape: f32[8,32], index: 8, kind: input, shape index: {}]   ;;  %s1053_s9 = inlined_call_operand.vmem [shape: f32[8,1], index: 9, kind: input, shape index: {}]   ;;  %s1054_s10 = inlined_call_operand.vmem [shape: f32[8,32], index: 10, kind: input, shape index: {}]   ;;  %s1055_s11 = inlined_call_operand.vmem [shape: f32[8,256], index: 11, kind: output, shape index: {}]  }
   0x1   :  { %s22_s19 = sshll.u32 %s1044_s0, 4  ;;  %s23_s19 = int_to_ptr.vmem [resolvable:$true] %s22_s19 }
   0x2   :  { %25 = dma.vmem_to_smem %s23_s19, 16, %s703_s20, [#allocation3]  }
   0x3   :  { %701 = dma.done.wait [#allocation3], 16  }
   0x4   :  { %702 = vsyncadd [#allocation3], 4294967280 }
   0x5   :  { %50 = sfence }
   0x6   :  { %v72_v0 = vld [vmem:[%s1045_s1] sm:$0xff]  ;;  %s51_s23 = sld [smem:[#allocation2]]  ;;  %v704_v1 = vmov 0   ;;  %v241_v2 = vld [vmem:[%s1051_s7 + $0x8] sm:$0xff]  ;;  %v58_v4 = vld [vmem:[%s1049_s5 + $0x18] sm:$0xff]  ;;  %vm90_vm0 = vcmask 1043456  }
   0x7   :  { %74 = vst [vmem:[#allocation1] ss:$2 sm:$0xff] %v72_v0  ;;  %655 = vset.pattern.permute.xlu1 %v704_v1  ;;  %654 = vset.pattern.permute.xlu0 %v704_v1  ;;  %v55_v3 = vld [vmem:[%s1049_s5] sm:$0xff]  ;;  %vm77_vm1 = vcmask 31744   ;;  %v56_v12 = vld [vmem:[%s1049_s5 + $0x8] sm:$0xff]  ;;  %v243_v14 = vld [vmem:[%s1051_s7 + $0x18] sm:$0xff] }
   0x8   :  { %251 = vperm.xlu1 %655, %v241_v2   ;;  %656 = vset.pattern.permute.xlu2 %v704_v1  ;;  %v153_v5 = vld [vmem:[%s1046_s2] sm:$0xff]  ;;  %v57_v20 = vld [vmem:[%s1049_s5 + $0x10] sm:$0xff]  ;;  %v65_v21 = vld [vmem:[%s1050_s6 + $0x8] sm:$0xff]  ;;  %s972_s27 = sld [smem:[#allocation2 + $0x1]]  ;;  %vm542_vm2 = vcmask 261120  }
   0x9   :  { %v240_v11 = vld [vmem:[%s1051_s7] sm:$0xff]  ;;  %261 = vperm.xlu0 %654, %v243_v14   ;;  %v242_v22 = vld [vmem:[%s1051_s7 + $0x10] sm:$0xff]  ;;  %v67_v29 = vld [vmem:[%s1050_s6 + $0x18] sm:$0xff]  ;;  %s974_s28 = sld [smem:[#allocation2 + $0x2]] }
   0xa   :  { %v64_v13 = vld [vmem:[%s1050_s6] sm:$0xff]  ;;  %v66_v27 = vld [vmem:[%s1050_s6 + $0x10] sm:$0xff] }
   0xb   :  { %v344_v15 = vld [vmem:[%s1047_s3] sm:$0xff] }
   0xc   :  { %v59_v6 = vstv %s51_s23 }
   0xd   :  { %v60_v7 = vmul.f32 %v59_v6, %v55_v3  ;;  %v63_v8 = vmul.f32 %v59_v6, %v58_v4  ;;  %v61_v16 = vmul.f32 %v59_v6, %v56_v12  ;;  %v68_v17 = vmul.f32 %v64_v13, %v59_v6 }
   0xe   :  { %v75_v9 = vld.sshfl [vmem:[#allocation1] sm:$0xff pattern:$0x75316420]  ;;  %v76_v10 = vld.sshfl [vmem:[#allocation1 + $0x8] sm:$0xff pattern:$0x75316420]  ;;  %v62_v23 = vmul.f32 %v59_v6, %v57_v20  ;;  %v69_v24 = vmul.f32 %v65_v21, %v59_v6  ;;  %v70_v28 = vmul.f32 %v66_v27, %v59_v6  ;;  %v71_v30 = vmul.f32 %v67_v29, %v59_v6 }
   0xf   :  { %618 = vmatpush.msk.msra.mxu0 %vm90_vm0, %v75_v9  ;;  %650 = vmatpush.msk.msra.mxu2 %vm90_vm0, %v75_v9  ;;  %155 = vst [vmem:[#allocation1] ss:$2 sm:$0xff] %v153_v5 }
  0x10   :  { %623 = vmatpush.msk.msra.mxu1 %vm90_vm0, %v76_v10  ;;  %651 = vmatpush.msk.msra.mxu3 %vm90_vm0, %v76_v10  ;;  %v557_v10 = vld [vmem:[%s1053_s9] sm:$0xff]  ;;  %s964_s9 = sld [smem:[#allocation2 + $0x3]] }
  0x11   :  { %619 = vmatmul.msk.f32.vlgmr.msra.gmra.mxu0 %vm77_vm1, %v60_v7  ;;  %622 = vmatmul.msk.f32.vlgmr.msra.gmra.mxu2 %vm77_vm1, %v63_v8 }
  0x12   :  { %624 = vmatmul.msk.f32.vlgmr.msra.gmra.mxu1 %vm77_vm1, %v60_v7  ;;  %627 = vmatmul.msk.f32.vlgmr.msra.gmra.mxu3 %vm77_vm1, %v63_v8 }
  0x13   :  { %246 = vperm.xlu1 %655, %v240_v11   ;;  %256 = vperm.xlu0 %654, %v242_v22  }
  0x14   :  { %560 = vperm.xlu2 %656, %v557_v10  }
  0x16   :  { %v156_v18 = vld.sshfl [vmem:[#allocation1] sm:$0xff pattern:$0x75316420]  ;;  %v157_v19 = vld.sshfl [vmem:[#allocation1 + $0x8] sm:$0xff pattern:$0x75316420] }
  0x17   :  { %628 = vmatpush.msk.msrb.mxu2 %vm90_vm0, %v156_v18  ;;  %633 = vmatpush.msk.msrb.mxu3 %vm90_vm0, %v157_v19  ;;  %346 = vst [vmem:[#allocation1] ss:$2 sm:$0xff] %v344_v15  ;;  %s532_s1 = ssub.f32 1.0, %s964_s9  ;;  %s531_s29 = smul.f32 0.125, %s964_s9 }
  0x19   :  { %620 = vmatmul.msk.f32.gmra.mxu0 %vm77_vm1, %v61_v16  ;;  %629 = vmatmul.msk.f32.vlgmr.msrb.gmra.mxu2 %vm77_vm1, %v68_v17  ;;  %s984_s30 = smul.f32 0.125, %s532_s1 }
  0x1a   :  { %625 = vmatmul.msk.f32.gmra.mxu1 %vm77_vm1, %v61_v16  ;;  %634 = vmatmul.msk.f32.vlgmr.msrb.gmra.mxu3 %vm77_vm1, %v68_v17 }
  0x1e   :  { %v347_v25 = vld.sshfl [vmem:[#allocation1] sm:$0xff pattern:$0x75316420]  ;;  %v348_v26 = vld.sshfl [vmem:[#allocation1 + $0x8] sm:$0xff pattern:$0x75316420] }
  0x1f   :  { %638 = vmatpush.msk.msrb.mxu0 %vm90_vm0, %v347_v25  ;;  %643 = vmatpush.msk.msrb.mxu1 %vm90_vm0, %v348_v26 }
  0x21   :  { %621 = vmatmul.msk.f32.gmra.mxu0 %vm77_vm1, %v62_v23  ;;  %630 = vmatmul.msk.f32.gmra.mxu2 %vm77_vm1, %v69_v24 }
  0x22   :  { %626 = vmatmul.msk.f32.gmra.mxu1 %vm77_vm1, %v62_v23  ;;  %635 = vmatmul.msk.f32.gmra.mxu3 %vm77_vm1, %v69_v24 }
  0x29   :  { %631 = vmatmul.msk.f32.gmra.mxu2 %vm77_vm1, %v70_v28  ;;  %639 = vmatmul.msk.f32.vlgmr.msrb.gmra.mxu0 %vm77_vm1, %v68_v17 }
  0x2a   :  { %636 = vmatmul.msk.f32.gmra.mxu3 %vm77_vm1, %v70_v28  ;;  %644 = vmatmul.msk.f32.vlgmr.msrb.gmra.mxu1 %vm77_vm1, %v68_v17 }
  0x31   :  { %632 = vmatmul.msk.f32.gmra.mxu2 %vm77_vm1, %v71_v30  ;;  %640 = vmatmul.msk.f32.gmra.mxu0 %vm77_vm1, %v69_v24 }
  0x32   :  { %637 = vmatmul.msk.f32.gmra.mxu3 %vm77_vm1, %v71_v30  ;;  %645 = vmatmul.msk.f32.gmra.mxu1 %vm77_vm1, %v69_v24 }
  0x39   :  { %641 = vmatmul.msk.f32.gmra.mxu0 %vm77_vm1, %v70_v28 }
  0x3a   :  { %646 = vmatmul.msk.f32.gmra.mxu1 %vm77_vm1, %v70_v28 }
  0x41   :  { %642 = vmatmul.msk.f32.gmra.mxu0 %vm77_vm1, %v71_v30 }
  0x42   :  { %647 = vmatmul.msk.f32.gmra.mxu1 %vm77_vm1, %v71_v30 }
  0x7a   :  { %v252_v35 = vpop.permute.xlu1 %251 }
  0x7b   :  { %v853_v45 = vpop.permute.xlu0 %261 }
  0x85   :  { %v247_v44 = vpop.permute.xlu1 %246  ;;  %v257_v3 = vpop.permute.xlu0 %256 }
  0x8e   :  { %v112_v31 = vpop.f32.mrf.mxu0 }
  0x8f   :  { %v141_v32 = vpop.f32.mrf.mxu1 }
  0x94   :  { %v845_v33 = vpop.f32.mrf.mxu2 }
  0x95   :  { %v847_v34 = vpop.f32.mrf.mxu3 }
  0x96   :  { %v115_v36 = vpop.f32.mrf.mxu0 }
  0x97   :  { %v144_v37 = vpop.f32.mrf.mxu1 }
  0x9c   :  { %v191_v38 = vpop.f32.mrf.mxu2 }
  0x9d   :  { %v220_v39 = vpop.f32.mrf.mxu3  ;;  %v232_v41 = vadd.f32 %v191_v38, %v112_v31 }
  0x9e   :  { %v849_v40 = vpop.f32.mrf.mxu0  ;;  %v233_v42 = vadd.f32 %v220_v39, %v141_v32 }
  0x9f   :  { %v851_v43 = vpop.f32.mrf.mxu1  ;;  %v855_v46 = vadd.f32 %v247_v44, %v232_v41 }
  0xa0   :  { %v857_v47 = vadd.f32 %v247_v44, %v233_v42 }
  0xa1   :  { %v272_v53 = vmul.f32 %v855_v46, %v855_v46 }
  0xa2   :  { %v273_v54 = vmul.f32 %v857_v47, %v857_v47 }
  0xa3   :  { %v280_v62 = vmul.f32 %v272_v53, %v855_v46 }
  0xa4   :  { %v194_v48 = vpop.f32.mrf.mxu2  ;;  %v281_v63 = vmul.f32 %v273_v54, %v857_v47 }
  0xa5   :  { %v234_v49 = vadd.f32 %v194_v48, %v115_v36  ;;  %v223_v50 = vpop.f32.mrf.mxu3  ;;  %v288_v11 = vmul.f32 0.044715, %v280_v62 }
  0xa6   :  { %v235_v51 = vadd.f32 %v223_v50, %v144_v37  ;;  %v370_v52 = vpop.f32.mrf.mxu0  ;;  %v289_v12 = vmul.f32 0.044715, %v281_v63 }
  0xa7   :  { %v863_v55 = vadd.f32 %v252_v35, %v234_v49  ;;  %v399_v56 = vpop.f32.mrf.mxu1  ;;  %v411_v58 = vadd.f32 %v370_v52, %v112_v31  ;;  %v901_v26 = vadd.f32 %v288_v11, %v855_v46 }
  0xa8   :  { %v865_v57 = vadd.f32 %v252_v35, %v235_v51  ;;  %v412_v60 = vadd.f32 %v399_v56, %v141_v32  ;;  %v904_v27 = vadd.f32 %v289_v12, %v857_v47 }
  0xa9   :  { %v274_v59 = vmul.f32 %v863_v55, %v863_v55  ;;  %v874_v1 = vadd.f32 %v411_v58, %v247_v44 }
  0xaa   :  { %v275_v61 = vmul.f32 %v865_v57, %v865_v57  ;;  %v876_v4 = vadd.f32 %v412_v60, %v247_v44 }
  0xab   :  { %v282_v0 = vmul.f32 %v274_v59, %v863_v55  ;;  %v427_v17 = vmul.f32 %v874_v1, %v874_v1 }
  0xac   :  { %v197_v2 = vpop.f32.mrf.mxu2  ;;  %v283_v7 = vmul.f32 %v275_v61, %v865_v57  ;;  %v428_v20 = vmul.f32 %v876_v4, %v876_v4 }
  0xad   :  { %v236_v5 = vadd.f32 %v197_v2, %v849_v40  ;;  %v226_v6 = vpop.f32.mrf.mxu3  ;;  %v290_v16 = vmul.f32 0.044715, %v282_v0  ;;  %v435_v31 = vmul.f32 %v427_v17, %v874_v1 }
  0xae   :  { %v237_v8 = vadd.f32 %v226_v6, %v851_v43  ;;  %v373_v9 = vpop.f32.mrf.mxu0  ;;  %v291_v23 = vmul.f32 0.044715, %v283_v7 }
  0xaf   :  { %v884_v13 = vadd.f32 %v257_v3, %v236_v5  ;;  %v413_v14 = vadd.f32 %v373_v9, %v115_v36  ;;  %v402_v15 = vpop.f32.mrf.mxu1  ;;  %v298_v30 = vadd.f32 %v290_v16, %v863_v55  ;;  %v443_v7 = vmul.f32 0.044715, %v435_v31 }
  0xb0   :  { %v888_v18 = vadd.f32 %v257_v3, %v237_v8  ;;  %v414_v19 = vadd.f32 %v402_v15, %v144_v37  ;;  %v436_v37 = vmul.f32 %v428_v20, %v876_v4  ;;  %v299_v44 = vadd.f32 %v291_v23, %v865_v57 }
  0xb1   :  { %v276_v21 = vmul.f32 %v884_v13, %v884_v13  ;;  %v894_v22 = vadd.f32 %v413_v14, %v252_v35  ;;  %v306_v59 = vmul.f32 0.7978846, %v298_v30 }
  0xb2   :  { %v277_v24 = vmul.f32 %v888_v18, %v888_v18  ;;  %v898_v25 = vadd.f32 %v414_v19, %v252_v35  ;;  %v307_v6 = vmul.f32 0.7978846, %v299_v44  ;;  %v444_v9 = vmul.f32 0.044715, %v436_v37 }
  0xb3   :  { %v284_v28 = vmul.f32 %v276_v21, %v884_v13  ;;  %v429_v29 = vmul.f32 %v894_v22, %v894_v22  ;;  %v451_v19 = vadd.f32 %v443_v7, %v874_v1 }
  0xb4   :  { %v285_v32 = vmul.f32 %v277_v24, %v888_v18  ;;  %v430_v35 = vmul.f32 %v898_v25, %v898_v25  ;;  %v200_v36 = vpop.f32.mrf.mxu2 }
  0xb5   :  { %v292_v38 = vmul.f32 0.044715, %v284_v28  ;;  %v437_v39 = vmul.f32 %v429_v29, %v894_v22  ;;  %v238_v41 = vadd.f32 %v200_v36, %v845_v33  ;;  %v229_v42 = vpop.f32.mrf.mxu3 }
  0xb6   :  { %v293_v48 = vmul.f32 0.044715, %v285_v32  ;;  %v438_v49 = vmul.f32 %v430_v35, %v898_v25  ;;  %v239_v50 = vadd.f32 %v229_v42, %v847_v34  ;;  %v376_v51 = vpop.f32.mrf.mxu0  ;;  %v452_v42 = vadd.f32 %v444_v9, %v876_v4 }
  0xb7   :  { %v300_v52 = vadd.f32 %v292_v38, %v884_v13  ;;  %v445_v53 = vmul.f32 0.044715, %v437_v39  ;;  %v922_v54 = vadd.f32 %v853_v45, %v238_v41  ;;  %v415_v56 = vadd.f32 %v376_v51, %v849_v40  ;;  %v405_v58 = vpop.f32.mrf.mxu1 }
  0xb8   :  { %v301_v60 = vadd.f32 %v293_v48, %v888_v18  ;;  %v927_v61 = vadd.f32 %v853_v45, %v239_v50  ;;  %v416_v62 = vadd.f32 %v405_v58, %v851_v43  ;;  %v446_v10 = vmul.f32 0.044715, %v438_v49 }
  0xb9   :  { %v308_v63 = vmul.f32 0.7978846, %v300_v52  ;;  %v453_v0 = vadd.f32 %v445_v53, %v894_v22  ;;  %v278_v2 = vmul.f32 %v922_v54, %v922_v54  ;;  %v933_v5 = vadd.f32 %v415_v56, %v257_v3 }
  0xba   :  { %v279_v40 = vmul.f32 %v927_v61, %v927_v61  ;;  %v937_v8 = vadd.f32 %v416_v62, %v257_v3  ;;  %v309_v12 = vmul.f32 0.7978846, %v301_v60  ;;  %v454_v24 = vadd.f32 %v446_v10, %v898_v25 }
  0xbb   :  { %v286_v11 = vmul.f32 %v278_v2, %v922_v54  ;;  %v431_v43 = vmul.f32 %v933_v5, %v933_v5  ;;  %657 = vtanh.f32 %v308_v63  ;;  %v461_v16 = vmul.f32 0.7978846, %v453_v0 }
  0xbc   :  { %v287_v14 = vmul.f32 %v279_v40, %v927_v61  ;;  %v432_v15 = vmul.f32 %v937_v8, %v937_v8  ;;  %659 = vtanh.f32 %v306_v59  ;;  %v462_v50 = vmul.f32 0.7978846, %v454_v24 }
  0xbd   :  { %v294_v17 = vmul.f32 0.044715, %v286_v11  ;;  %v439_v3 = vmul.f32 %v431_v43, %v933_v5  ;;  %661 = vtanh.f32 %v307_v6  ;;  %v304_v53 = vmul.f32 0.7978846, %v901_v26 }
  0xbe   :  { %v295_v20 = vmul.f32 0.044715, %v287_v14  ;;  %v440_v21 = vmul.f32 %v432_v15, %v937_v8  ;;  %v379_v23 = vpop.f32.mrf.mxu0  ;;  %663 = vtanh.f32 %v309_v12  ;;  %v459_v59 = vmul.f32 0.7978846, %v451_v19 }
  0xbf   :  { %v302_v28 = vadd.f32 %v294_v17, %v922_v54  ;;  %v447_v29 = vmul.f32 0.044715, %v439_v3  ;;  %v417_v30 = vadd.f32 %v379_v23, %v845_v33  ;;  %v408_v31 = vpop.f32.mrf.mxu1  ;;  %665 = vtanh.f32 %v461_v16 }
  0xc0   :  { %v303_v32 = vadd.f32 %v295_v20, %v927_v61  ;;  %v448_v35 = vmul.f32 0.044715, %v440_v21  ;;  %v418_v36 = vadd.f32 %v408_v31, %v847_v34  ;;  %v460_v63 = vmul.f32 0.7978846, %v452_v42 }
  0xc1   :  { %v310_v37 = vmul.f32 0.7978846, %v302_v28  ;;  %v455_v38 = vadd.f32 %v447_v29, %v933_v5  ;;  %v955_v39 = vadd.f32 %v417_v30, %v853_v45  ;;  %v658_v41 = vpop.eup %657  ;;  %v305_v6 = vmul.f32 0.7978846, %v904_v27 }
  0xc2   :  { %v311_v44 = vmul.f32 0.7978846, %v303_v32  ;;  %v456_v33 = vadd.f32 %v448_v35, %v937_v8  ;;  %v960_v48 = vadd.f32 %v418_v36, %v853_v45  ;;  %v660_v49 = vpop.eup %659  ;;  %v324_v60 = vadd.f32 1.0, %v658_v41 }
  0xc3   :  { %667 = vtanh.f32 %v310_v37  ;;  %v463_v34 = vmul.f32 0.7978846, %v455_v38  ;;  %v433_v51 = vmul.f32 %v955_v39, %v955_v39  ;;  %v662_v52 = vpop.eup %661  ;;  %v322_v40 = vadd.f32 1.0, %v660_v49 }
  0xc4   :  { %669 = vtanh.f32 %v311_v44  ;;  %v464_v56 = vmul.f32 0.7978846, %v456_v33  ;;  %v434_v58 = vmul.f32 %v960_v48, %v960_v48  ;;  %v664_v62 = vpop.eup %663  ;;  %v323_v9 = vadd.f32 1.0, %v662_v52 }
  0xc5   :  { %671 = vtanh.f32 %v463_v34  ;;  %v441_v45 = vmul.f32 %v433_v51, %v955_v39  ;;  %v666_v2 = vpop.eup %665  ;;  %v332_v43 = vmul.f32 0.5, %v324_v60  ;;  %v325_v12 = vadd.f32 1.0, %v664_v62 }
  0xc6   :  { %673 = vtanh.f32 %v464_v56  ;;  %v442_v0 = vmul.f32 %v434_v58, %v960_v48  ;;  %v477_v15 = vadd.f32 1.0, %v666_v2  ;;  %v330_v21 = vmul.f32 0.5, %v322_v40 }
  0xc7   :  { %675 = vtanh.f32 %v462_v50  ;;  %v449_v26 = vmul.f32 0.044715, %v441_v45  ;;  %v331_v23 = vmul.f32 0.5, %v323_v9  ;;  %v340_v29 = vmul.f32 %v332_v43, %v884_v13  ;;  %v538_v45 = vld [vmem:[%s1048_s4] sm:$0xff] }
  0xc8   :  { %v450_v7 = vmul.f32 0.044715, %v442_v0  ;;  %677 = vtanh.f32 %v304_v53  ;;  %v333_v30 = vmul.f32 0.5, %v325_v12  ;;  %v485_v35 = vmul.f32 0.5, %v477_v15 }
  0xc9   :  { %v668_v10 = vpop.eup %667  ;;  %679 = vtanh.f32 %v459_v59  ;;  %v457_v11 = vadd.f32 %v449_v26, %v955_v39  ;;  %v982_v37 = vstv %s972_s27  ;;  %v987_v44 = vstv %s974_s28 }
  0xca   :  { %v670_v14 = vpop.eup %669  ;;  %681 = vtanh.f32 %v460_v63  ;;  %v458_v27 = vadd.f32 %v450_v7, %v960_v48  ;;  %v326_v19 = vadd.f32 1.0, %v668_v10  ;;  %v338_v33 = vmul.f32 %v330_v21, %v863_v55 }
  0xcb   :  { %v672_v16 = vpop.eup %671  ;;  %v465_v17 = vmul.f32 0.7978846, %v457_v11  ;;  %683 = vtanh.f32 %v305_v6  ;;  %v327_v28 = vadd.f32 1.0, %v670_v14  ;;  %v504_v34 = vmul.f32 %v982_v37, %v340_v29 }
  0xcc   :  { %v674_v3 = vpop.eup %673  ;;  %v466_v20 = vmul.f32 0.7978846, %v458_v27  ;;  %v479_v32 = vadd.f32 1.0, %v672_v16  ;;  %v334_v42 = vmul.f32 0.5, %v326_v19  ;;  %v341_v51 = vmul.f32 %v333_v30, %v888_v18  ;;  %v539_v18 = vld [vmem:[%s1048_s4 + $0x8] sm:$0xff] }
  0xcd   :  { %v676_v24 = vpop.eup %675  ;;  %685 = vtanh.f32 %v465_v17  ;;  %v480_v38 = vadd.f32 1.0, %v674_v3  ;;  %v335_v50 = vmul.f32 0.5, %v327_v28  ;;  %v339_v52 = vmul.f32 %v331_v23, %v865_v57 }
  0xce   :  { %v678_v31 = vpop.eup %677  ;;  %687 = vtanh.f32 %v466_v20  ;;  %v478_v13 = vadd.f32 1.0, %v676_v24  ;;  %v487_v53 = vmul.f32 0.5, %v479_v32  ;;  %v493_v56 = vmul.f32 %v485_v35, %v894_v22 }
  0xcf   :  { %v680_v36 = vpop.eup %679  ;;  %v320_v58 = vadd.f32 1.0, %v678_v31  ;;  %v488_v60 = vmul.f32 0.5, %v480_v38  ;;  %v534_v63 = vstv %s531_s29  ;;  %v535_v0 = vstv %s984_s30 }
  0xd0   :  { %v682_v41 = vpop.eup %681  ;;  %v475_v59 = vadd.f32 1.0, %v680_v36  ;;  %v342_v57 = vmul.f32 %v334_v42, %v922_v54  ;;  %v486_v22 = vmul.f32 0.5, %v478_v13  ;;  %v343_v26 = vmul.f32 %v335_v50, %v927_v61 }
  0xd1   :  { %v684_v49 = vpop.eup %683  ;;  %v476_v62 = vadd.f32 1.0, %v682_v41  ;;  %v540_v9 = vmul.f32 %v538_v45, %v534_v63  ;;  %v495_v11 = vmul.f32 %v487_v53, %v933_v5  ;;  %v541_v12 = vmul.f32 %v539_v18, %v535_v0 }
  0xd2   :  { %v321_v40 = vadd.f32 1.0, %v684_v49  ;;  %v483_v43 = vmul.f32 0.5, %v475_v59  ;;  %v496_v27 = vmul.f32 %v488_v60, %v937_v8  ;;  %v494_v17 = vmul.f32 %v486_v22, %v898_v25  ;;  %v525_v59 = vld [vmem:[%s1052_s8] sm:$0xff] }
  0xd3   :  { %v686_v55 = vpop.eup %685  ;;  %v484_v15 = vmul.f32 0.5, %v476_v62  ;;  %v543_v16 = vsel %vm542_vm2, %v540_v9, 0.0  ;;  %v328_v3 = vmul.f32 0.5, %v320_v58  ;;  %v544_v61 = vsel %vm542_vm2, %v541_v12, 0.0  ;;  %v561_v62 = vpop.permute.xlu2 %560 }
  0xd4   :  { %v688_v2 = vpop.eup %687  ;;  %v481_v6 = vadd.f32 1.0, %v686_v55  ;;  %v506_v20 = vmul.f32 %v982_v37, %v342_v57  ;;  %v329_v5 = vmul.f32 0.5, %v321_v40  ;;  %v545_v21 = vadd.f32 %v544_v61, %v543_v16 }
  0xd5   :  { %v482_v7 = vadd.f32 1.0, %v688_v2  ;;  %v507_v8 = vmul.f32 %v982_v37, %v343_v26  ;;  %v513_v24 = vmul.f32 %v987_v44, %v495_v11  ;;  %v491_v28 = vmul.f32 %v483_v43, %v874_v1 }
  0xd6   :  { %v489_v10 = vmul.f32 0.5, %v481_v6  ;;  %v514_v25 = vmul.f32 %v987_v44, %v496_v27  ;;  %v492_v29 = vmul.f32 %v484_v15, %v876_v4  ;;  %v546_v30 = vrot.slane %v545_v21, 4 }
  0xd7   :  { %v490_v14 = vmul.f32 0.5, %v482_v7  ;;  %v505_v31 = vmul.f32 %v982_v37, %v341_v51  ;;  %v511_v32 = vmul.f32 %v987_v44, %v493_v56  ;;  %v336_v35 = vmul.f32 %v328_v3, %v855_v46 }
  0xd8   :  { %v497_v54 = vmul.f32 %v489_v10, %v955_v39  ;;  %v512_v38 = vmul.f32 %v987_v44, %v494_v17  ;;  %v337_v41 = vmul.f32 %v329_v5, %v857_v47  ;;  %v547_v1 = vadd.f32 %v546_v30, %v545_v21 }
  0xd9   :  { %v498_v19 = vmul.f32 %v490_v14, %v960_v48  ;;  %v521_v42 = vadd.f32 %v513_v24, %v504_v34  ;;  %v502_v13 = vmul.f32 %v982_v37, %v338_v33  ;;  %v509_v4 = vmul.f32 %v987_v44, %v491_v28 }
  0xda   :  { %v515_v23 = vmul.f32 %v987_v44, %v497_v54  ;;  %v522_v49 = vadd.f32 %v514_v25, %v505_v31  ;;  %v503_v50 = vmul.f32 %v982_v37, %v339_v52  ;;  %v510_v51 = vmul.f32 %v987_v44, %v492_v29 }
  0xdb   :  { %v516_v39 = vmul.f32 %v987_v44, %v498_v19  ;;  %v548_v53 = vrot.slane %v547_v1, 2  ;;  %v519_v46 = vadd.f32 %v511_v32, %v502_v13  ;;  %v500_v56 = vmul.f32 %v982_v37, %v336_v35  ;;  %v552_v44 = vld [vmem:[%s1054_s10] sm:$0xff] }
  0xdc   :  { %v523_v48 = vadd.f32 %v515_v23, %v506_v20  ;;  %v520_v47 = vadd.f32 %v512_v38, %v503_v50  ;;  %v501_v58 = vmul.f32 %v982_v37, %v337_v41 }
  0xdd   :  { %v524_v36 = vadd.f32 %v516_v39, %v507_v8  ;;  %v549_v34 = vadd.f32 %v548_v53, %v547_v1  ;;  %v517_v33 = vadd.f32 %v509_v4, %v500_v56 }
  0xde   :  { %578 = vmatpush.msra.mxu2 %v523_v48  ;;  %v518_v52 = vadd.f32 %v510_v51, %v501_v58 }
  0xdf   :  { %598 = vmatpush.msra.mxu3 %v524_v36  ;;  %v550_v45 = vrot.slane %v549_v34, 1 }
  0xe0   :  { %579 = vmatpush.msra.mxu2 %v521_v42 }
  0xe1   :  { %599 = vmatpush.msra.mxu3 %v522_v49  ;;  %v551_v55 = vadd.f32 %v550_v45, %v549_v34 }
  0xe2   :  { %580 = vmatpush.msra.mxu2 %v519_v46 }
  0xe3   :  { %600 = vmatpush.msra.mxu3 %v520_v47  ;;  %v553_v37 = vmul.f32 %v552_v44, %v551_v55 }
  0xe4   :  { %581 = vmatpush.msra.mxu2 %v517_v33 }
  0xe5   :  { %601 = vmatpush.msra.mxu3 %v518_v52  ;;  %648 = vmatmul.msk.f32.vlgmr.msra.gmra.mxu2 %vm542_vm2, %v525_v59  ;;  %v554_v60 = vsel %vm542_vm2, %v553_v37, 0.0 }
  0xe6   :  { %649 = vmatmul.msk.f32.vlgmr.msra.gmra.mxu3 %vm542_vm2, %v525_v59  ;;  %555 = vadd.xlane.f32.xlu2 %v554_v60 }
 0x159   :  { %v556_v0 = vpop.xlane.xlu2 %555 }
 0x168   :  { %v583_v63 = vpop.f32.mrf.mxu2 }
 0x169   :  { %v584_v18 = vadd.f32 %v583_v63, %v561_v62  ;;  %v603_v2 = vpop.f32.mrf.mxu3 }
 0x16a   :  { %v604_v57 = vadd.f32 %v603_v2, %v561_v62 }
 0x16b   :  { %v606_v6 = vadd.f32 %v584_v18, %v556_v0 }
 0x16c   :  { %v607_v22 = vadd.f32 %v604_v57, %v556_v0 }
 0x16d   :  { %608 = vst [vmem:[%s1055_s11] sm:$0xff] %v606_v6 }
 0x16e   :  { %609 = vst [vmem:[%s1055_s11 + $0x8] sm:$0xff] %v607_v22 }
 0x16f   :  { %614 = vsyncpa [#allocation3], 1 }

</bundles_post_ra>
